<compile_context>
chip_gen: v5e
topology: v5e:2x2
jax: 0.10.0
libtpu: 0.0.40
codegen_flags: <defaults>
</compile_context>

<pallas_src>
import jax
import jax.numpy as jnp
from jax.experimental import pallas as pl
from jax.experimental.pallas import tpu as pltpu


def _concat_kernel(x_ref, y_ref, o_ref):
    # x_ref: (TB, C1*HW), y_ref: (TB, C2*HW), o_ref: (TB, (C1+C2)*HW)
    cx = x_ref.shape[1]
    o_ref[:, :cx] = x_ref[...]
    o_ref[:, cx:] = y_ref[...]


def _choose_row_block(n_rows, bytes_per_row_total, vmem_budget_bytes):
    """Pick rows-per-step so the double-buffered working set fits the budget."""
    # Double buffering: 2 copies each of x-, y- and out-blocks ~= 2 * 2 * row bytes.
    per_row = 2 * bytes_per_row_total
    max_tb = max(1, vmem_budget_bytes // max(per_row, 1))
    if max_tb >= n_rows:
        return n_rows
    # Prefer a sublane-friendly (multiple of 8) divisor of n_rows.
    for tb in range(min(max_tb, n_rows), 0, -1):
        if n_rows % tb == 0 and tb % 8 == 0:
            return tb
    for tb in range(min(max_tb, n_rows), 0, -1):
        if n_rows % tb == 0:
            return tb
    return 1


def concat_channels(x, y):
    """Equivalent of torch.cat([x, y], dim=1) for NCHW tensors."""
    assert x.ndim == 4 and y.ndim == 4
    N, C1, H, W = x.shape
    N2, C2, H2, W2 = y.shape
    assert (N, H, W) == (N2, H2, W2), "non-concat dims must match"
    assert x.dtype == y.dtype

    HW = H * W
    C_out = C1 + C2

    # Flatten each sample so the concat axis becomes a lane offset.
    x2 = x.reshape(N, C1 * HW)
    y2 = y.reshape(N, C2 * HW)

    itemsize = jnp.dtype(x.dtype).itemsize
    # x row + y row + out row bytes (out row == x row + y row).
    bytes_per_row_total = 2 * C_out * HW * itemsize

    # Conservative budget (works on v5e/v6e/v7x); vmem_limit below gives headroom.
    vmem_budget = 32 * 1024 * 1024
    TB = _choose_row_block(N, bytes_per_row_total, vmem_budget)
    grid = (N // TB,)

    cost = pl.CostEstimate(
        flops=0,
        transcendentals=0,
        bytes_accessed=2 * (x.size * itemsize + y.size * itemsize),
    )

    out = pl.pallas_call(
        _concat_kernel,
        out_shape=jax.ShapeDtypeStruct((N, C_out * HW), x.dtype),
        grid_spec=pltpu.PrefetchScalarGridSpec(
            num_scalar_prefetch=0,
            grid=grid,
            in_specs=[
                pl.BlockSpec((TB, C1 * HW), lambda i: (i, 0)),
                pl.BlockSpec((TB, C2 * HW), lambda i: (i, 0)),
            ],
            out_specs=pl.BlockSpec((TB, C_out * HW), lambda i: (i, 0)),
        ),
        compiler_params=pltpu.CompilerParams(
            dimension_semantics=("parallel",),
            vmem_limit_bytes=48 * 1024 * 1024,
        ),
        cost_estimate=cost,
    )(x2, y2)

    return out.reshape(N, C_out, H, W)


if __name__ == "__main__":
    key = jax.random.PRNGKey(0)
    kx, ky = jax.random.split(key)

    # Small NCHW inputs (matching PyTorch's convention).
    x = jax.random.normal(kx, (2, 4, 16, 16), dtype=jnp.float32)
    y = jax.random.normal(ky, (2, 6, 16, 16), dtype=jnp.float32)

    out = concat_channels(x, y)
    out = jax.block_until_ready(out)

    # Correctness check vs. plain JAX concat (same semantics as torch.cat dim=1).
    ref = jnp.concatenate([x, y], axis=1)
    assert out.shape == (2, 10, 16, 16)
    assert jnp.array_equal(out, ref)

    print("KERNEL_OK")
</pallas_src>

<mosaic_0001>
module attributes {stable_mosaic.version = 11 : i64} {
  func.func @_concat_kernel(%arg0: i32, %arg1: memref<2x1024xf32, #tpu.memory_space<vmem>>, %arg2: memref<2x1536xf32, #tpu.memory_space<vmem>>, %arg3: memref<2x2560xf32, #tpu.memory_space<vmem>>) attributes {dimension_semantics = [#tpu.dimension_semantics<parallel>], iteration_bounds = array<i64: 1>, scalar_prefetch = 0 : i64, scratch_operands = 0 : i64, tpu.core_type = #tpu.core_type<tc>, window_params = [{transform_indices = @transform_0, window_bounds = array<i64: 2, 1024>}, {transform_indices = @transform_1, window_bounds = array<i64: 2, 1536>}, {transform_indices = @transform_2, window_bounds = array<i64: 2, 2560>}]} {
    %c0 = arith.constant 0 : index
    %c0_0 = arith.constant 0 : index
    %0 = vector.load %arg1[%c0, %c0_0] : memref<2x1024xf32, #tpu.memory_space<vmem>>, vector<2x1024xf32>
    %c0_1 = arith.constant 0 : index
    %c0_2 = arith.constant 0 : index
    %1 = vector.load %arg3[%c0_1, %c0_2] : memref<2x2560xf32, #tpu.memory_space<vmem>>, vector<2x1024xf32>
    tpu.vector_store %arg3[%c0_1, %c0_2], %0 {strides = array<i32>} : memref<2x2560xf32, #tpu.memory_space<vmem>>, vector<2x1024xf32>,
    %c0_3 = arith.constant 0 : index
    %c0_4 = arith.constant 0 : index
    %2 = vector.load %arg2[%c0_3, %c0_4] : memref<2x1536xf32, #tpu.memory_space<vmem>>, vector<2x1536xf32>
    %c0_5 = arith.constant 0 : index
    %c1024 = arith.constant 1024 : index
    %3 = vector.load %arg3[%c0_5, %c1024] : memref<2x2560xf32, #tpu.memory_space<vmem>>, vector<2x1536xf32>
    tpu.vector_store %arg3[%c0_5, %c1024], %2 {strides = array<i32>} : memref<2x2560xf32, #tpu.memory_space<vmem>>, vector<2x1536xf32>,
    return
  }
  func.func @transform_0(%arg0: i32) -> (i32, i32) {
    %c0_i32 = arith.constant 0 : i32
    %c0_i32_0 = arith.constant 0 : i32
    return %arg0, %c0_i32 : i32, i32
  }
  func.func @transform_1(%arg0: i32) -> (i32, i32) {
    %c0_i32 = arith.constant 0 : i32
    %c0_i32_0 = arith.constant 0 : i32
    return %arg0, %c0_i32 : i32, i32
  }
  func.func @transform_2(%arg0: i32) -> (i32, i32) {
    %c0_i32 = arith.constant 0 : i32
    %c0_i32_0 = arith.constant 0 : i32
    return %arg0, %c0_i32 : i32, i32
  }
}

</mosaic_0001>

<bundles_post_ra>
// kernel: tpu_custom_call.1
= control target key start
LH: loop header
LB: loop body
LE: loop exit
PB: predicated region body
PF: predicated region fallthrough
CT: control target
= control target key end

     0   :  { %7 = vsyncpa [#allocation3], 0  ;;  %s176_s0 = inlined_call_operand.hbm [shape: f32[2,1024], index: 0, kind: input, shape index: {}]   ;;  %s177_s1 = inlined_call_operand.hbm [shape: f32[2,1536], index: 1, kind: input, shape index: {}]   ;;  %s178_s2 = inlined_call_operand.hbm [shape: f32[2,2560], index: 2, kind: output, shape index: {}]  }
   0x1   :  { %8 = vsyncpa [#allocation6], 0 }
   0x2   :  { %9 = vsyncpa [#allocation4], 0  ;;  %s15_s11 = sshll.u32 %s176_s0, 4  ;;  %s149_s12 = smov [#allocation2]   ;;  %s16_s11 = int_to_ptr.hbm [resolvable:$true] %s15_s11 }
   0x3   :  { %s17_s13 = sshll.u32 %s149_s12, 4  ;;  %s26_s16 = sshll.u32 %s177_s1, 4  ;;  %s18_s13 = int_to_ptr.vmem [resolvable:$true] %s17_s13  ;;  %s27_s16 = int_to_ptr.hbm [resolvable:$true] %s26_s16 }
   0x4   :  { %20 = dma.hbm_to_vmem [thread:$0]  %s16_s11, 256, %s18_s13, [#allocation3]  }
   0x5   :  { %s150_s17 = smov [#allocation5]  }
   0x6   :  { %s28_s18 = sshll.u32 %s150_s17, 4  ;;  %s29_s18 = int_to_ptr.vmem [resolvable:$true] %s28_s18 }
   0x7   :  { %31 = dma.hbm_to_vmem [thread:$0]  %s27_s16, 384, %s29_s18, [#allocation6]  }
   0x8   :  { %143 = dma.done.wait [#allocation3], 256  }
   0x9   :  { %144 = vsyncadd [#allocation3], 4294967040 }
   0xa   :  { %145 = dma.done.wait [#allocation6], 384  }
   0xb   :  { %146 = vsyncadd [#allocation6], 4294966912  ;;  %v40_v0 = vld [vmem:[#allocation2] sm:$0xff]  ;;  %v41_v1 = vld [vmem:[#allocation2 + $0x8] sm:$0xff]  ;;  %s151_s0 = smov [#allocation7]   ;;  %s57_s22 = sshll.u32 %s178_s2, 4  ;;  %s58_s22 = int_to_ptr.hbm [resolvable:$true] %s57_s22 }
   0xc   :  { %v44_v2 = vld [vmem:[#allocation5] sm:$0xff]  ;;  %s55_s19 = sshll.u32 %s151_s0, 4  ;;  %42 = vst [vmem:[#allocation7] sm:$0xff] %v40_v0  ;;  %v45_v3 = vld [vmem:[#allocation5 + $0x8] sm:$0xff]  ;;  %v46_v4 = vld [vmem:[#allocation5 + $0x10] sm:$0xff]  ;;  %s56_s19 = int_to_ptr.vmem [resolvable:$true] %s55_s19 }
   0xd   :  { %43 = vst [vmem:[#allocation7 + $0x8] sm:$0xff] %v41_v1 }
   0xe   :  { %47 = vst [vmem:[#allocation7 + $0x10] sm:$0xff] %v44_v2 }
   0xf   :  { %48 = vst [vmem:[#allocation7 + $0x18] sm:$0xff] %v45_v3 }
  0x10   :  { %49 = vst [vmem:[#allocation7 + $0x20] sm:$0xff] %v46_v4 }
  0x11   :  { %60 = dma.vmem_to_hbm [thread:$0]  %s56_s19, 640, %s58_s22, [#allocation4]  }
  0x12   :  { %147 = dma.done.wait [#allocation4], 640  }
  0x13   :  { %148 = vsyncadd [#allocation4], 4294966656 }
  0x14   :  { %65 = vsyncpa [#allocation3], 1 }
  0x15   :  { %66 = vsyncpa [#allocation6], 1 }
  0x16   :  { %67 = vsyncpa [#allocation4], 1 }

</bundles_post_ra>
